<compile_context>
chip_gen: v7x
topology: tpu7x:2x2x1
jax: 0.10.0
libtpu: 0.0.40
codegen_flags: <defaults>
</compile_context>

<pallas_src>
import functools

import numpy as np
import jax
import jax.numpy as jnp
from jax.experimental import pallas as pl
from jax.experimental.pallas import tpu as pltpu

HID = 100        # original hidden width
HP = 128         # padded hidden width (one lane tile)
IN_DIM = 3
ACT_DIM = 2
OUT1 = 3
MAX_TB = 512     # batch-tile cap (sweepable: 256 / 512 / 1024 all fit VMEM)


def _round_up(x, m):
    return (x + m - 1) // m * m


def _dense(x, w, b):
    # Cast activations to the weight dtype (bf16 by default) for the MXU,
    # accumulate in f32, add the f32 bias.
    return jnp.dot(x.astype(w.dtype), w, preferred_element_type=jnp.float32) + b


# ----------------------------------------------------------------------------
# Kernels
# ----------------------------------------------------------------------------
def _node_kernel_fused(s_ref, w_in_ref, b_in_ref, w_mid_ref, b_mid_ref,
                       w_head_ref, b_head_ref, out_ref):
    """v6e/v7x path: 256-wide block-diagonal layers, fused head."""
    s = s_ref[...]                                                    # (TB, 8) f32
    h = jnp.maximum(_dense(s, w_in_ref[...], b_in_ref[...]), 0.0)    # (TB, 256)
    for l in range(3):  # net layers 2,3,4 (g block of layer 4 is identity)
        h = jnp.maximum(_dense(h, w_mid_ref[l], b_mid_ref[l]), 0.0)
    head = _dense(h, w_head_ref[...], b_head_ref[...])               # (TB, 24)
    # cols 0:8 -> [f_x | 0], 8:16 -> [g_col0 | 0], 16:24 -> [g_col1 | 0]
    a0 = s[:, 3:4]   # action 0, broadcast in-register (lane splat)
    a1 = s[:, 4:5]   # action 1
    out_ref[...] = head[:, 0:8] + head[:, 8:16] * a0 + head[:, 16:24] * a1


def _node_kernel_split(s_ref, w_in_ref, b_in_ref, wf_ref, bf_ref, wg_ref, bg_ref,
                       whf_ref, bhf_ref, whg_ref, bhg_ref, out_ref):
    """v5e/v5p path: 128-wide layers (MXU is 128x128 there)."""
    s = s_ref[...]                                                    # (TB, 8) f32
    h = jnp.maximum(_dense(s, w_in_ref[...], b_in_ref[...]), 0.0)    # (TB, 256)
    hf = h[:, 0:HP]
    hg = h[:, HP:2 * HP]
    for l in range(3):                       # f layers 2,3,4
        hf = jnp.maximum(_dense(hf, wf_ref[l], bf_ref[l]), 0.0)
    for l in range(2):                       # g layers 2,3
        hg = jnp.maximum(_dense(hg, wg_ref[l], bg_ref[l]), 0.0)
    fh = _dense(hf, whf_ref[...], bhf_ref[...])   # (TB, 8)  [f_x | 0]
    gh = _dense(hg, whg_ref[...], bhg_ref[...])   # (TB, 16) [g0 |0| g1 |0]
    a0 = s[:, 3:4]
    a1 = s[:, 4:5]
    out_ref[...] = fh + gh[:, 0:8] * a0 + gh[:, 8:16] * a1


# ----------------------------------------------------------------------------
# Parameter packing (done once, outside jit)
# ----------------------------------------------------------------------------
def pack_params(f_params, g_params, fused, dtype=jnp.bfloat16):
    f = [(np.asarray(w, np.float32), np.asarray(b, np.float32).reshape(1, -1))
         for w, b in f_params]
    g = [(np.asarray(w, np.float32), np.asarray(b, np.float32).reshape(1, -1))
         for w, b in g_params]

    # Fused first layer: input padded to 8 cols (state 0:3, action 3:5, zeros).
    # Rows 3:8 of the weight are zero, so the action columns contribute nothing.
    w_in = np.zeros((8, 2 * HP), np.float32)
    b_in = np.zeros((1, 2 * HP), np.float32)
    w_in[:IN_DIM, :HID] = f[0][0]
    w_in[:IN_DIM, HP:HP + HID] = g[0][0]
    b_in[:, :HID] = f[0][1]
    b_in[:, HP:HP + HID] = g[0][1]

    # g head re-layout: even output cols -> g_x[:,:,0], odd -> g_x[:,:,1]
    gw4, gb4 = g[3]
    gw_c0, gb_c0 = gw4[:, 0::2], gb4[:, 0::2]     # (100,3), (1,3)
    gw_c1, gb_c1 = gw4[:, 1::2], gb4[:, 1::2]
    fw5, fb5 = f[4]

    if fused:
        w_mid = np.zeros((3, 2 * HP, 2 * HP), np.float32)
        b_mid = np.zeros((3, 1, 2 * HP), np.float32)
        for l in range(2):                                   # net layers 2, 3
            w_mid[l, :HID, :HID] = f[l + 1][0]
            w_mid[l, HP:HP + HID, HP:HP + HID] = g[l + 1][0]
            b_mid[l, :, :HID] = f[l + 1][1]
            b_mid[l, :, HP:HP + HID] = g[l + 1][1]
        # layer 4: f block real, g block = identity (ReLU(x)=x for x>=0)
        w_mid[2, :HID, :HID] = f[3][0]
        b_mid[2, :, :HID] = f[3][1]
        w_mid[2, HP:, HP:] = np.eye(HP, dtype=np.float32)

        # Fused head: rows 0:128 act on h_f, rows 128:256 on h_g.
        w_head = np.zeros((2 * HP, 24), np.float32)
        b_head = np.zeros((1, 24), np.float32)
        w_head[:HID, 0:3] = fw5
        w_head[HP:HP + HID, 8:11] = gw_c0
        w_head[HP:HP + HID, 16:19] = gw_c1
        b_head[:, 0:3] = fb5
        b_head[:, 8:11] = gb_c0
        b_head[:, 16:19] = gb_c1
        arrs = (w_in, b_in, w_mid, b_mid, w_head, b_head)
    else:
        wf = np.zeros((3, HP, HP), np.float32)
        bf = np.zeros((3, 1, HP), np.float32)
        for l in range(3):
            wf[l, :HID, :HID] = f[l + 1][0]
            bf[l, :, :HID] = f[l + 1][1]
        wg = np.zeros((2, HP, HP), np.float32)
        bg = np.zeros((2, 1, HP), np.float32)
        for l in range(2):
            wg[l, :HID, :HID] = g[l + 1][0]
            bg[l, :, :HID] = g[l + 1][1]
        whf = np.zeros((HP, 8), np.float32)
        bhf = np.zeros((1, 8), np.float32)
        whf[:HID, 0:3] = fw5
        bhf[:, 0:3] = fb5
        whg = np.zeros((HP, 16), np.float32)
        bhg = np.zeros((1, 16), np.float32)
        whg[:HID, 0:3] = gw_c0
        bhg[:, 0:3] = gb_c0
        whg[:HID, 8:11] = gw_c1
        bhg[:, 8:11] = gb_c1
        arrs = (w_in, b_in, wf, bf, wg, bg, whf, bhf, whg, bhg)

    # Weights (even positions) in compute dtype; biases kept f32.
    return tuple(jnp.asarray(a, dtype if i % 2 == 0 else jnp.float32)
                 for i, a in enumerate(arrs))


def _device_kind():
    try:
        return jax.devices()[0].device_kind.lower()
    except Exception:
        return ""


def use_fused_layers():
    """256-wide block-diag fusion pays off on v6e/v7x (256-wide MXU), not v5*."""
    kind = _device_kind()
    return "v5" not in kind


def _num_tensorcores():
    """Cores a 'parallel' grid axis can shard over (v7x; megacore v4/v5p)."""
    kind = _device_kind()
    if ("v7" in kind) or ("v4" in kind) or ("v5p" in kind):
        return 2
    return 1


def _choose_tb(B):
    """Batch tile: big enough to amortize per-step overhead, small enough to
    give every TensorCore at least one grid step, capped at MAX_TB rows."""
    cores = _num_tensorcores()
    tb = -(-B // cores)                  # ceil(B / cores)
    tb = _round_up(max(tb, 8), 8)
    return min(tb, MAX_TB)


# ----------------------------------------------------------------------------
# Forward wrapper
# ----------------------------------------------------------------------------
@functools.partial(jax.jit, static_argnames=("fused",))
def neural_ode_forward(t, s, packed, fused=True):
    """Equivalent of NeuralODEModel.forward(t, s); `t` is unused (as in torch)."""
    del t
    B = s.shape[0]
    TB = _choose_tb(B)
    B_pad = _round_up(B, TB)

    # Single wrapper op: pad rows to the tile multiple and columns 5 -> 8
    # (cols 3:4 still hold the actions; the extra cols hit zero weight rows).
    s_in = jnp.pad(s.astype(jnp.float32), ((0, B_pad - B), (0, 3)))   # (B_pad, 8)

    kernel = _node_kernel_fused if fused else _node_kernel_split
    row_spec = pl.BlockSpec((TB, 8), lambda i: (i, 0))

    def weight_spec(arr):
        n = arr.ndim
        return pl.BlockSpec(arr.shape, lambda i, _n=n: (0,) * _n)  # resident

    out = pl.pallas_call(
        kernel,
        out_shape=jax.ShapeDtypeStruct((B_pad, 8), jnp.float32),
        grid=(B_pad // TB,),
        in_specs=[row_spec] + [weight_spec(p) for p in packed],
        out_specs=pl.BlockSpec((TB, 8), lambda i: (i, 0)),
        compiler_params=pltpu.CompilerParams(
            dimension_semantics=("parallel",)),
    )(s_in, *packed)
    return out[:B, :5]


# ----------------------------------------------------------------------------
# Init + pure-JAX reference
# ----------------------------------------------------------------------------
def init_params(key):
    """PyTorch-style (uniform +-1/sqrt(fan_in)) Linear init."""
    def linear(key, fan_in, fan_out):
        kw, kb = jax.random.split(key)
        bound = 1.0 / jnp.sqrt(jnp.float32(fan_in))
        w = jax.random.uniform(kw, (fan_in, fan_out), jnp.float32, -bound, bound)
        b = jax.random.uniform(kb, (1, fan_out), jnp.float32, -bound, bound)
        return w, b

    keys = jax.random.split(key, 9)
    f_dims = [(IN_DIM, HID), (HID, HID), (HID, HID), (HID, HID), (HID, OUT1)]
    g_dims = [(IN_DIM, HID), (HID, HID), (HID, HID), (HID, 2 * OUT1)]
    f_params = [linear(keys[i], *f_dims[i]) for i in range(5)]
    g_params = [linear(keys[5 + i], *g_dims[i]) for i in range(4)]
    return f_params, g_params


def reference_forward(t, s, f_params, g_params):
    del t
    x = s[:, 0:3]
    act = s[:, 3:5]
    h = x
    for i, (w, b) in enumerate(f_params):
        h = h @ w + b
        if i < len(f_params) - 1:
            h = jnp.maximum(h, 0.0)
    f_x = h
    g = x
    for i, (w, b) in enumerate(g_params):
        g = g @ w + b
        if i < len(g_params) - 1:
            g = jnp.maximum(g, 0.0)
    g_x = g.reshape(-1, 3, 2)
    bmm = jnp.squeeze(g_x @ act.reshape(-1, 2, 1), -1)
    ds = f_x + bmm
    return jnp.concatenate([ds, jnp.zeros_like(act)], axis=-1)


if __name__ == "__main__":
    key = jax.random.PRNGKey(0)
    kp, ks, ks2 = jax.random.split(key, 3)
    f_params, g_params = init_params(kp)
    t = jnp.float32(0.0)

    fused_default = use_fused_layers()

    # Small batch.
    B = 8
    s = jax.random.normal(ks, (B, 5), dtype=jnp.float32)
    ref = reference_forward(t, s, f_params, g_params)

    # 1) f32 weights on the default path: tight numerical check of structure.
    packed_f32 = pack_params(f_params, g_params, fused=fused_default,
                             dtype=jnp.float32)
    out = jax.block_until_ready(
        neural_ode_forward(t, s, packed_f32, fused=fused_default))
    assert out.shape == (B, 5)
    assert jnp.allclose(out, ref, atol=2e-4, rtol=2e-4), (out, ref)

    # 2) bf16 weights (production default) on both kernel paths: looser tol.
    for fused in (fused_default, not fused_default):
        packed_bf16 = pack_params(f_params, g_params, fused=fused,
                                  dtype=jnp.bfloat16)
        out = jax.block_until_ready(
            neural_ode_forward(t, s, packed_bf16, fused=fused))
        assert out.shape == (B, 5)
        assert jnp.allclose(out, ref, atol=5e-2, rtol=5e-2), (fused, out, ref)

    # 3) Larger batch: exercises multi-step grid (on 2-TC chips) + row padding.
    B2 = 200
    s2 = jax.random.normal(ks2, (B2, 5), dtype=jnp.float32)
    ref2 = reference_forward(t, s2, f_params, g_params)
    packed = pack_params(f_params, g_params, fused=fused_default,
                         dtype=jnp.bfloat16)
    out2 = jax.block_until_ready(
        neural_ode_forward(t, s2, packed, fused=fused_default))
    assert out2.shape == (B2, 5)
    assert jnp.allclose(out2, ref2, atol=5e-2, rtol=5e-2)

    print("KERNEL_OK")
</pallas_src>

<mosaic_0001>
module attributes {stable_mosaic.version = 11 : i64} {
  func.func @_node_kernel_fused(%arg0: i32, %arg1: memref<8x8xf32, #tpu.memory_space<vmem>>, %arg2: memref<8x256xf32, #tpu.memory_space<vmem>>, %arg3: memref<1x256xf32, #tpu.memory_space<vmem>>, %arg4: memref<3x256x256xf32, #tpu.memory_space<vmem>>, %arg5: memref<3x1x256xf32, #tpu.memory_space<vmem>>, %arg6: memref<256x24xf32, #tpu.memory_space<vmem>>, %arg7: memref<1x24xf32, #tpu.memory_space<vmem>>, %arg8: memref<8x8xf32, #tpu.memory_space<vmem>>) attributes {dimension_semantics = [#tpu.dimension_semantics<parallel>], iteration_bounds = array<i64: 1>, scalar_prefetch = 0 : i64, scratch_operands = 0 : i64, tpu.core_type = #tpu.core_type<tc>, window_params = [{transform_indices = @transform_0, window_bounds = array<i64: 8, 8>}, {pipeline_mode = #tpu.pipeline_mode<synchronous>, transform_indices = @transform_1, window_bounds = array<i64: 8, 256>}, {pipeline_mode = #tpu.pipeline_mode<synchronous>, transform_indices = @transform_2, window_bounds = array<i64: 1, 256>}, {pipeline_mode = #tpu.pipeline_mode<synchronous>, transform_indices = @transform_3, window_bounds = array<i64: 3, 256, 256>}, {pipeline_mode = #tpu.pipeline_mode<synchronous>, transform_indices = @transform_4, window_bounds = array<i64: 3, 1, 256>}, {pipeline_mode = #tpu.pipeline_mode<synchronous>, transform_indices = @transform_5, window_bounds = array<i64: 256, 24>}, {pipeline_mode = #tpu.pipeline_mode<synchronous>, transform_indices = @transform_6, window_bounds = array<i64: 1, 24>}, {transform_indices = @transform_7, window_bounds = array<i64: 8, 8>}]} {
    %c0 = arith.constant 0 : index
    %c0_0 = arith.constant 0 : index
    %0 = vector.load %arg1[%c0, %c0_0] : memref<8x8xf32, #tpu.memory_space<vmem>>, vector<8x8xf32>
    %c0_1 = arith.constant 0 : index
    %c0_2 = arith.constant 0 : index
    %1 = vector.load %arg2[%c0_1, %c0_2] : memref<8x256xf32, #tpu.memory_space<vmem>>, vector<8x256xf32>
    %c0_3 = arith.constant 0 : index
    %c0_4 = arith.constant 0 : index
    %2 = vector.load %arg3[%c0_3, %c0_4] : memref<1x256xf32, #tpu.memory_space<vmem>>, vector<1x256xf32>
    %cst = arith.constant dense<0.000000e+00> : vector<8x256xf32>
    %3 = tpu.matmul %0, %1, %cst {dimension_numbers = #tpu.dot_dimension_numbers<[1], [0], [0], [1], [0, 0, 1, 1], [], []>} : vector<8x8xf32>, vector<8x256xf32>, vector<8x256xf32> -> vector<8x256xf32>
    %4 = vector.broadcast %2 : vector<1x256xf32> to vector<8x256xf32>
    %5 = arith.addf %3, %4 : vector<8x256xf32>
    %cst_5 = arith.constant 0.000000e+00 : f32
    %6 = vector.broadcast %cst_5 : f32 to vector<8x256xf32>
    %7 = arith.maximumf %5, %6 : vector<8x256xf32>
    %c0_6 = arith.constant 0 : index
    %c0_7 = arith.constant 0 : index
    %c0_8 = arith.constant 0 : index
    %8 = vector.load %arg4[%c0_6, %c0_7, %c0_8] : memref<3x256x256xf32, #tpu.memory_space<vmem>>, vector<1x256x256xf32>
    %9 = vector.shape_cast %8 : vector<1x256x256xf32> to vector<256x256xf32>
    %c0_9 = arith.constant 0 : index
    %c0_10 = arith.constant 0 : index
    %c0_11 = arith.constant 0 : index
    %10 = vector.load %arg5[%c0_9, %c0_10, %c0_11] : memref<3x1x256xf32, #tpu.memory_space<vmem>>, vector<1x1x256xf32>
    %11 = vector.shape_cast %10 : vector<1x1x256xf32> to vector<1x256xf32>
    %cst_12 = arith.constant dense<0.000000e+00> : vector<8x256xf32>
    %12 = tpu.matmul %7, %9, %cst_12 {dimension_numbers = #tpu.dot_dimension_numbers<[1], [0], [0], [1], [0, 0, 1, 1], [], []>} : vector<8x256xf32>, vector<256x256xf32>, vector<8x256xf32> -> vector<8x256xf32>
    %13 = vector.broadcast %11 : vector<1x256xf32> to vector<8x256xf32>
    %14 = arith.addf %12, %13 : vector<8x256xf32>
    %cst_13 = arith.constant 0.000000e+00 : f32
    %15 = vector.broadcast %cst_13 : f32 to vector<8x256xf32>
    %16 = arith.maximumf %14, %15 : vector<8x256xf32>
    %c1 = arith.constant 1 : index
    %c0_14 = arith.constant 0 : index
    %c0_15 = arith.constant 0 : index
    %17 = vector.load %arg4[%c1, %c0_14, %c0_15] : memref<3x256x256xf32, #tpu.memory_space<vmem>>, vector<1x256x256xf32>
    %18 = vector.shape_cast %17 : vector<1x256x256xf32> to vector<256x256xf32>
    %c1_16 = arith.constant 1 : index
    %c0_17 = arith.constant 0 : index
    %c0_18 = arith.constant 0 : index
    %19 = vector.load %arg5[%c1_16, %c0_17, %c0_18] : memref<3x1x256xf32, #tpu.memory_space<vmem>>, vector<1x1x256xf32>
    %20 = vector.shape_cast %19 : vector<1x1x256xf32> to vector<1x256xf32>
    %cst_19 = arith.constant dense<0.000000e+00> : vector<8x256xf32>
    %21 = tpu.matmul %16, %18, %cst_19 {dimension_numbers = #tpu.dot_dimension_numbers<[1], [0], [0], [1], [0, 0, 1, 1], [], []>} : vector<8x256xf32>, vector<256x256xf32>, vector<8x256xf32> -> vector<8x256xf32>
    %22 = vector.broadcast %20 : vector<1x256xf32> to vector<8x256xf32>
    %23 = arith.addf %21, %22 : vector<8x256xf32>
    %cst_20 = arith.constant 0.000000e+00 : f32
    %24 = vector.broadcast %cst_20 : f32 to vector<8x256xf32>
    %25 = arith.maximumf %23, %24 : vector<8x256xf32>
    %c2 = arith.constant 2 : index
    %c0_21 = arith.constant 0 : index
    %c0_22 = arith.constant 0 : index
    %26 = vector.load %arg4[%c2, %c0_21, %c0_22] : memref<3x256x256xf32, #tpu.memory_space<vmem>>, vector<1x256x256xf32>
    %27 = vector.shape_cast %26 : vector<1x256x256xf32> to vector<256x256xf32>
    %c2_23 = arith.constant 2 : index
    %c0_24 = arith.constant 0 : index
    %c0_25 = arith.constant 0 : index
    %28 = vector.load %arg5[%c2_23, %c0_24, %c0_25] : memref<3x1x256xf32, #tpu.memory_space<vmem>>, vector<1x1x256xf32>
    %29 = vector.shape_cast %28 : vector<1x1x256xf32> to vector<1x256xf32>
    %cst_26 = arith.constant dense<0.000000e+00> : vector<8x256xf32>
    %30 = tpu.matmul %25, %27, %cst_26 {dimension_numbers = #tpu.dot_dimension_numbers<[1], [0], [0], [1], [0, 0, 1, 1], [], []>} : vector<8x256xf32>, vector<256x256xf32>, vector<8x256xf32> -> vector<8x256xf32>
    %31 = vector.broadcast %29 : vector<1x256xf32> to vector<8x256xf32>
    %32 = arith.addf %30, %31 : vector<8x256xf32>
    %cst_27 = arith.constant 0.000000e+00 : f32
    %33 = vector.broadcast %cst_27 : f32 to vector<8x256xf32>
    %34 = arith.maximumf %32, %33 : vector<8x256xf32>
    %c0_28 = arith.constant 0 : index
    %c0_29 = arith.constant 0 : index
    %35 = vector.load %arg6[%c0_28, %c0_29] : memref<256x24xf32, #tpu.memory_space<vmem>>, vector<256x24xf32>
    %c0_30 = arith.constant 0 : index
    %c0_31 = arith.constant 0 : index
    %36 = vector.load %arg7[%c0_30, %c0_31] : memref<1x24xf32, #tpu.memory_space<vmem>>, vector<1x24xf32>
    %cst_32 = arith.constant dense<0.000000e+00> : vector<8x24xf32>
    %37 = tpu.matmul %34, %35, %cst_32 {dimension_numbers = #tpu.dot_dimension_numbers<[1], [0], [0], [1], [0, 0, 1, 1], [], []>} : vector<8x256xf32>, vector<256x24xf32>, vector<8x24xf32> -> vector<8x24xf32>
    %38 = vector.broadcast %36 : vector<1x24xf32> to vector<8x24xf32>
    %39 = arith.addf %37, %38 : vector<8x24xf32>
    %40 = vector.extract_strided_slice %0 {offsets = [0, 3], sizes = [8, 1], strides = [1, 1]} : vector<8x8xf32> to vector<8x1xf32>
    %41 = vector.extract_strided_slice %0 {offsets = [0, 4], sizes = [8, 1], strides = [1, 1]} : vector<8x8xf32> to vector<8x1xf32>
    %42 = vector.extract_strided_slice %39 {offsets = [0, 0], sizes = [8, 8], strides = [1, 1]} : vector<8x24xf32> to vector<8x8xf32>
    %43 = vector.extract_strided_slice %39 {offsets = [0, 8], sizes = [8, 8], strides = [1, 1]} : vector<8x24xf32> to vector<8x8xf32>
    %44 = vector.broadcast %40 : vector<8x1xf32> to vector<8x8xf32>
    %45 = arith.mulf %43, %44 : vector<8x8xf32>
    %46 = arith.addf %42, %45 : vector<8x8xf32>
    %47 = vector.extract_strided_slice %39 {offsets = [0, 16], sizes = [8, 8], strides = [1, 1]} : vector<8x24xf32> to vector<8x8xf32>
    %48 = vector.broadcast %41 : vector<8x1xf32> to vector<8x8xf32>
    %49 = arith.mulf %47, %48 : vector<8x8xf32>
    %50 = arith.addf %46, %49 : vector<8x8xf32>
    %c0_33 = arith.constant 0 : index
    %c0_34 = arith.constant 0 : index
    %51 = vector.load %arg8[%c0_33, %c0_34] : memref<8x8xf32, #tpu.memory_space<vmem>>, vector<8x8xf32>
    tpu.vector_store %arg8[%c0_33, %c0_34], %50 {strides = array<i32>} : memref<8x8xf32, #tpu.memory_space<vmem>>, vector<8x8xf32>,
    return
  }
  func.func @transform_0(%arg0: i32) -> (i32, i32) {
    %c0_i32 = arith.constant 0 : i32
    %c0_i32_0 = arith.constant 0 : i32
    return %arg0, %c0_i32 : i32, i32
  }
  func.func @transform_1(%arg0: i32) -> (i32, i32) {
    %c0_i32 = arith.constant 0 : i32
    %c0_i32_0 = arith.constant 0 : i32
    %c0_i32_1 = arith.constant 0 : i32
    return %c0_i32, %c0_i32_0 : i32, i32
  }
  func.func @transform_2(%arg0: i32) -> (i32, i32) {
    %c0_i32 = arith.constant 0 : i32
    %c0_i32_0 = arith.constant 0 : i32
    %c0_i32_1 = arith.constant 0 : i32
    return %c0_i32, %c0_i32_0 : i32, i32
  }
  func.func @transform_3(%arg0: i32) -> (i32, i32, i32) {
    %c0_i32 = arith.constant 0 : i32
    %c0_i32_0 = arith.constant 0 : i32
    %c0_i32_1 = arith.constant 0 : i32
    %c0_i32_2 = arith.constant 0 : i32
    return %c0_i32, %c0_i32_0, %c0_i32_1 : i32, i32, i32
  }
  func.func @transform_4(%arg0: i32) -> (i32, i32, i32) {
    %c0_i32 = arith.constant 0 : i32
    %c0_i32_0 = arith.constant 0 : i32
    %c0_i32_1 = arith.constant 0 : i32
    %c0_i32_2 = arith.constant 0 : i32
    return %c0_i32, %c0_i32_0, %c0_i32_1 : i32, i32, i32
  }
  func.func @transform_5(%arg0: i32) -> (i32, i32) {
    %c0_i32 = arith.constant 0 : i32
    %c0_i32_0 = arith.constant 0 : i32
    %c0_i32_1 = arith.constant 0 : i32
    return %c0_i32, %c0_i32_0 : i32, i32
  }
  func.func @transform_6(%arg0: i32) -> (i32, i32) {
    %c0_i32 = arith.constant 0 : i32
    %c0_i32_0 = arith.constant 0 : i32
    %c0_i32_1 = arith.constant 0 : i32
    return %c0_i32, %c0_i32_0 : i32, i32
  }
  func.func @transform_7(%arg0: i32) -> (i32, i32) {
    %c0_i32 = arith.constant 0 : i32
    %c0_i32_0 = arith.constant 0 : i32
    return %arg0, %c0_i32 : i32, i32
  }
}

</mosaic_0001>

<bundles_post_ra>
// kernel: neural_ode_forward.1
= control target key start
LH: loop header
LB: loop body
LE: loop exit
PB: predicated region body
PF: predicated region fallthrough
CT: control target
= control target key end

     0   :  { %12 = vsyncpa [#allocation3], 0  ;;  %s1263_s0 = inlined_call_operand.vmem [shape: f32[8,8], index: 0, kind: input, shape index: {}]   ;;  %s1264_s1 = inlined_call_operand.vmem [shape: f32[8,256], index: 1, kind: input, shape index: {}]   ;;  %s1265_s2 = inlined_call_operand.vmem [shape: f32[1,256], index: 2, kind: input, shape index: {}]   ;;  %s1266_s3 = inlined_call_operand.hbm [shape: f32[3,256,256], index: 3, kind: input, shape index: {}]   ;;  %s1267_s4 = inlined_call_operand.vmem [shape: f32[3,1,256], index: 4, kind: input, shape index: {}]   ;;  %s1268_s5 = inlined_call_operand.vmem [shape: f32[256,24], index: 5, kind: input, shape index: {}]   ;;  %s1269_s6 = inlined_call_operand.vmem [shape: f32[1,24], index: 6, kind: input, shape index: {}]   ;;  %s1270_s7 = inlined_call_operand.hbm [shape: f32[8,8], index: 7, kind: output, shape index: {}]  }
   0x1   :  { %13 = vsyncpa [#allocation4], 0  ;;  %s1051_s24 = smov [#allocation2]   ;;  %s1003_s28 = scalar_lea.hbm %s1266_s3, 24576 }
   0x2   :  { %s25_s25 = sshll.u32 %s1051_s24, 4  ;;  %p1004_p0 = scmp.ne.s32.totalorder %s1266_s3, %s1003_s28  ;;  %s26_s25 = int_to_ptr.vmem [resolvable:$true] %s25_s25 }
   0x3   :  { %p1007_p1 = scmp.lt.u32.totalorder %s1003_s28, %s1266_s3 }
   0x5   :  { %p1009_p2 = pnand %p1007_p1, %p1004_p0 }
   0x7   :  { %1012 = shalt.err (!%p1009_p2)
}
   0x8   :  { %s1013_s10 = scalar_lea.vmem %s26_s25, 24576  ;;  %p1018_p4 = scmp.lt.s32.totalorder %s26_s25, %s26_s25 }
   0x9   :  { %p1014_p3 = scmp.ne.s32.totalorder %s26_s25, %s1013_s10  ;;  %p1019_p5 = scmp.lt.s32.totalorder %s1013_s10, %s1013_s10 }
   0xb   :  { %p1020_p6 = por %p1019_p5, %p1018_p4 }
   0xd   :  { %p1021_p7 = pnand %p1020_p6, %p1014_p3 }
   0xf   :  { %1024 = shalt.err (!%p1021_p7)
}
  0x10   :  { %s1052_s11 = smov 256   ;;  %s1053_s12 = smov 16  }
  0x11   :  { %31 = dma.hbm_to_vmem [thread:$0]  %s1266_s3, 24576, %s26_s25, [#allocation3], %s1052_s11, %s1052_s11, %s1053_s12  }
  0x12   :  { %1047 = dma.done.wait [#allocation3], 24576  }
  0x13   :  { %1048 = vsyncadd [#allocation3], 4294942720  ;;  %v1054_v0 = vmov 0.0   ;;  %v43_v1 = vld [vmem:[%s1264_s1 + $0x8] sm:$0xff]  ;;  %v42_v2 = vld [vmem:[%s1264_s1] sm:$0xff]  ;;  %vm56_vm0 = vcmask 64512  }
  0x14   :  { %124 = vmatprep.mubr.f32.mxu0 %v1054_v0  ;;  %v1121_v3 = vld [vmem:[%s1263_s0] sm:$0xff]  ;;  %60 = vmatprep.subr.mxu0 %v43_v1  ;;  %v134_v4 = vld [vmem:[#allocation2 + $0x8] sm:$0xff]  ;;  %v133_v6 = vld [vmem:[#allocation2] sm:$0xff]  ;;  %s1058_s13 = smov 112   ;;  %s1059_s14 = smov [#allocation5]  }
  0x15   :  { %v136_v5 = vld [vmem:[#allocation2 + $0x18] sm:$0xff]  ;;  %61 = vmatpush1.msra.mxu0 %v42_v2  ;;  %v135_v8 = vld [vmem:[#allocation2 + $0x10] sm:$0xff]  ;;  %v138_v9 = vld [vmem:[#allocation2 + $0x28] sm:$0xff]  ;;  %s720_s15 = sshll.u32 %s1059_s14, 4  ;;  %s721_s15 = int_to_ptr.vmem [resolvable:$true] %s720_s15 }
  0x16   :  { %v768_v7 = vpack.c.bf16 %v136_v5, %v134_v4  ;;  %v140_v10 = vld [vmem:[#allocation2 + $0x38] sm:$0xff]  ;;  %729 = vmatmul.mubr.msk.f32.vlgmr.msra.gmra.mrb[0].mxu0 %vm56_vm0, %v1121_v3  ;;  %v770_v11 = vpack.c.bf16 %v135_v8, %v133_v6  ;;  %v137_v13 = vld [vmem:[#allocation2 + $0x20] sm:$0xff]  ;;  %v139_v14 = vld [vmem:[#allocation2 + $0x30] sm:$0xff]  ;;  %p1030_p9 = scmp.lt.s32.totalorder %s721_s15, %s721_s15 }
  0x17   :  { %v772_v12 = vpack.c.bf16 %v140_v10, %v138_v9  ;;  %v142_v15 = vld [vmem:[#allocation2 + $0x48] sm:$0xff]  ;;  %v144_v16 = vld [vmem:[#allocation2 + $0x58] sm:$0xff]  ;;  %v774_v17 = vpack.c.bf16 %v139_v14, %v137_v13  ;;  %v141_v19 = vld [vmem:[#allocation2 + $0x40] sm:$0xff] }
  0x18   :  { %769 = vmatprep.subr.bf16.mxu1 %v768_v7  ;;  %v776_v18 = vpack.c.bf16 %v144_v16, %v142_v15  ;;  %v143_v20 = vld [vmem:[#allocation2 + $0x50] sm:$0xff]  ;;  %v146_v21 = vld [vmem:[#allocation2 + $0x68] sm:$0xff]  ;;  %v148_v22 = vld [vmem:[#allocation2 + $0x78] sm:$0xff] }
  0x19   :  { %771 = vmatpush1.bf16.msra.mxu1 %v770_v11  ;;  %v778_v23 = vpack.c.bf16 %v143_v20, %v141_v19  ;;  %v780_v24 = vpack.c.bf16 %v148_v22, %v146_v21  ;;  %v145_v25 = vld [vmem:[#allocation2 + $0x60] sm:$0xff]  ;;  %v147_v26 = vld [vmem:[#allocation2 + $0x70] sm:$0xff]  ;;  %v150_v27 = vld [vmem:[#allocation2 + $0x88] sm:$0xff] }
  0x1a   :  { %773 = vmatprep.subr.bf16.mxu1 %v772_v12  ;;  %v152_v28 = vld [vmem:[#allocation2 + $0x98] sm:$0xff]  ;;  %v782_v29 = vpack.c.bf16 %v147_v26, %v145_v25  ;;  %v149_v31 = vld [vmem:[#allocation2 + $0x80] sm:$0xff]  ;;  %v151_v32 = vld [vmem:[#allocation2 + $0x90] sm:$0xff] }
  0x1b   :  { %v784_v30 = vpack.c.bf16 %v152_v28, %v150_v27  ;;  %v154_v33 = vld [vmem:[#allocation2 + $0xa8] sm:$0xff]  ;;  %v156_v34 = vld [vmem:[#allocation2 + $0xb8] sm:$0xff]  ;;  %v786_v35 = vpack.c.bf16 %v151_v32, %v149_v31  ;;  %v153_v37 = vld [vmem:[#allocation2 + $0xa0] sm:$0xff] }
  0x1c   :  { %v788_v36 = vpack.c.bf16 %v156_v34, %v154_v33  ;;  %v155_v38 = vld [vmem:[#allocation2 + $0xb0] sm:$0xff]  ;;  %v158_v39 = vld [vmem:[#allocation2 + $0xc8] sm:$0xff]  ;;  %v160_v40 = vld [vmem:[#allocation2 + $0xd8] sm:$0xff] }
  0x1d   :  { %775 = vmatpush1.bf16.msra.mxu1 %v774_v17  ;;  %v790_v41 = vpack.c.bf16 %v155_v38, %v153_v37  ;;  %v792_v42 = vpack.c.bf16 %v160_v40, %v158_v39  ;;  %v157_v43 = vld [vmem:[#allocation2 + $0xc0] sm:$0xff]  ;;  %v159_v44 = vld [vmem:[#allocation2 + $0xd0] sm:$0xff]  ;;  %v162_v45 = vld [vmem:[#allocation2 + $0xe8] sm:$0xff] }
  0x1e   :  { %777 = vmatprep.subr.bf16.mxu1 %v776_v18  ;;  %v164_v46 = vld [vmem:[#allocation2 + $0xf8] sm:$0xff]  ;;  %v794_v47 = vpack.c.bf16 %v159_v44, %v157_v43  ;;  %v161_v49 = vld [vmem:[#allocation2 + $0xe0] sm:$0xff]  ;;  %v163_v50 = vld [vmem:[#allocation2 + $0xf0] sm:$0xff] }
  0x1f   :  { %v796_v48 = vpack.c.bf16 %v164_v46, %v162_v45  ;;  %v166_v51 = vld [vmem:[#allocation2 + $0x108] sm:$0xff]  ;;  %v168_v52 = vld [vmem:[#allocation2 + $0x118] sm:$0xff]  ;;  %v798_v53 = vpack.c.bf16 %v163_v50, %v161_v49  ;;  %v165_v55 = vld [vmem:[#allocation2 + $0x100] sm:$0xff] }
  0x20   :  { %v800_v54 = vpack.c.bf16 %v168_v52, %v166_v51  ;;  %v167_v56 = vld [vmem:[#allocation2 + $0x110] sm:$0xff]  ;;  %v170_v57 = vld [vmem:[#allocation2 + $0x128] sm:$0xff]  ;;  %v172_v58 = vld [vmem:[#allocation2 + $0x138] sm:$0xff] }
  0x21   :  { %779 = vmatpush1.bf16.msra.mxu1 %v778_v23  ;;  %v802_v59 = vpack.c.bf16 %v167_v56, %v165_v55  ;;  %v804_v60 = vpack.c.bf16 %v172_v58, %v170_v57  ;;  %v169_v61 = vld [vmem:[#allocation2 + $0x120] sm:$0xff]  ;;  %v171_v62 = vld [vmem:[#allocation2 + $0x130] sm:$0xff]  ;;  %v174_v63 = vld [vmem:[#allocation2 + $0x148] sm:$0xff] }
  0x22   :  { %781 = vmatprep.subr.bf16.mxu1 %v780_v24  ;;  %v176_v0 = vld [vmem:[#allocation2 + $0x158] sm:$0xff]  ;;  %v806_v1 = vpack.c.bf16 %v171_v62, %v169_v61  ;;  %v173_v4 = vld [vmem:[#allocation2 + $0x140] sm:$0xff]  ;;  %v175_v5 = vld [vmem:[#allocation2 + $0x150] sm:$0xff] }
  0x23   :  { %v808_v2 = vpack.c.bf16 %v176_v0, %v174_v63  ;;  %v178_v6 = vld [vmem:[#allocation2 + $0x168] sm:$0xff]  ;;  %v180_v7 = vld [vmem:[#allocation2 + $0x178] sm:$0xff]  ;;  %v810_v8 = vpack.c.bf16 %v175_v5, %v173_v4  ;;  %v177_v10 = vld [vmem:[#allocation2 + $0x160] sm:$0xff] }
  0x24   :  { %v812_v9 = vpack.c.bf16 %v180_v7, %v178_v6  ;;  %v179_v11 = vld [vmem:[#allocation2 + $0x170] sm:$0xff]  ;;  %v182_v12 = vld [vmem:[#allocation2 + $0x188] sm:$0xff]  ;;  %v184_v13 = vld [vmem:[#allocation2 + $0x198] sm:$0xff] }
  0x25   :  { %783 = vmatpush1.bf16.msra.mxu1 %v782_v29  ;;  %v814_v14 = vpack.c.bf16 %v179_v11, %v177_v10  ;;  %v816_v15 = vpack.c.bf16 %v184_v13, %v182_v12  ;;  %v181_v16 = vld [vmem:[#allocation2 + $0x180] sm:$0xff]  ;;  %v183_v17 = vld [vmem:[#allocation2 + $0x190] sm:$0xff]  ;;  %v186_v18 = vld [vmem:[#allocation2 + $0x1a8] sm:$0xff] }
  0x26   :  { %785 = vmatprep.subr.bf16.mxu1 %v784_v30  ;;  %v188_v19 = vld [vmem:[#allocation2 + $0x1b8] sm:$0xff]  ;;  %v818_v20 = vpack.c.bf16 %v183_v17, %v181_v16  ;;  %v185_v22 = vld [vmem:[#allocation2 + $0x1a0] sm:$0xff]  ;;  %v187_v23 = vld [vmem:[#allocation2 + $0x1b0] sm:$0xff] }
  0x27   :  { %v820_v21 = vpack.c.bf16 %v188_v19, %v186_v18  ;;  %v190_v24 = vld [vmem:[#allocation2 + $0x1c8] sm:$0xff]  ;;  %v192_v25 = vld [vmem:[#allocation2 + $0x1d8] sm:$0xff]  ;;  %v822_v26 = vpack.c.bf16 %v187_v23, %v185_v22  ;;  %v189_v28 = vld [vmem:[#allocation2 + $0x1c0] sm:$0xff] }
  0x28   :  { %v824_v27 = vpack.c.bf16 %v192_v25, %v190_v24  ;;  %v191_v29 = vld [vmem:[#allocation2 + $0x1d0] sm:$0xff]  ;;  %v194_v31 = vld [vmem:[#allocation2 + $0x1e8] sm:$0xff]  ;;  %v196_v32 = vld [vmem:[#allocation2 + $0x1f8] sm:$0xff] }
  0x29   :  { %787 = vmatpush1.bf16.msra.mxu1 %v786_v35  ;;  %v826_v30 = vpack.c.bf16 %v191_v29, %v189_v28  ;;  %v828_v33 = vpack.c.bf16 %v196_v32, %v194_v31  ;;  %v193_v34 = vld [vmem:[#allocation2 + $0x1e0] sm:$0xff]  ;;  %v195_v35 = vld [vmem:[#allocation2 + $0x1f0] sm:$0xff]  ;;  %v284_v37 = vld [vmem:[#allocation2 + $0x208] sm:$0xff] }
  0x2a   :  { %789 = vmatprep.subr.bf16.mxu1 %v788_v36  ;;  %v830_v36 = vpack.c.bf16 %v195_v35, %v193_v34  ;;  %v286_v38 = vld [vmem:[#allocation2 + $0x218] sm:$0xff]  ;;  %v283_v39 = vld [vmem:[#allocation2 + $0x200] sm:$0xff]  ;;  %v321_v32 = vld [vmem:[#allocation2 + $0x330] sm:$0xff] }
  0x2b   :  { %v832_v40 = vpack.c.bf16 %v286_v38, %v284_v37  ;;  %v290_v43 = vld [vmem:[#allocation2 + $0x238] sm:$0xff]  ;;  %v287_v46 = vld [vmem:[#allocation2 + $0x220] sm:$0xff]  ;;  %v325_v38 = vld [vmem:[#allocation2 + $0x350] sm:$0xff] }
  0x2c   :  { %v294_v49 = vld [vmem:[#allocation2 + $0x258] sm:$0xff]  ;;  %v291_v52 = vld [vmem:[#allocation2 + $0x240] sm:$0xff] }
  0x2d   :  { %791 = vmatpush1.bf16.msra.mxu1 %v790_v41  ;;  %v285_v41 = vld [vmem:[#allocation2 + $0x210] sm:$0xff]  ;;  %833 = vmatprep.subr.bf16.mxu0 %v832_v40  ;;  %v298_v55 = vld [vmem:[#allocation2 + $0x278] sm:$0xff]  ;;  %v295_v58 = vld [vmem:[#allocation2 + $0x260] sm:$0xff] }
  0x2e   :  { %793 = vmatprep.subr.bf16.mxu1 %v792_v42  ;;  %v288_v42 = vld [vmem:[#allocation2 + $0x228] sm:$0xff]  ;;  %v834_v44 = vpack.c.bf16 %v285_v41, %v283_v39  ;;  %v302_v61 = vld [vmem:[#allocation2 + $0x298] sm:$0xff]  ;;  %v299_v0 = vld [vmem:[#allocation2 + $0x280] sm:$0xff] }
  0x2f   :  { %v836_v45 = vpack.c.bf16 %v290_v43, %v288_v42  ;;  %v306_v4 = vld [vmem:[#allocation2 + $0x2b8] sm:$0xff]  ;;  %v303_v7 = vld [vmem:[#allocation2 + $0x2a0] sm:$0xff]  ;;  %v328_v39 = vld [vmem:[#allocation2 + $0x368] sm:$0xff] }
  0x30   :  { %835 = vmatpush1.bf16.msra.mxu0 %v834_v44  ;;  %v310_v10 = vld [vmem:[#allocation2 + $0x2d8] sm:$0xff]  ;;  %v307_v13 = vld [vmem:[#allocation2 + $0x2c0] sm:$0xff]  ;;  %v329_v44 = vld [vmem:[#allocation2 + $0x370] sm:$0xff] }
  0x31   :  { %795 = vmatpush1.bf16.msra.mxu1 %v794_v47  ;;  %v289_v47 = vld [vmem:[#allocation2 + $0x230] sm:$0xff]  ;;  %837 = vmatprep.subr.bf16.mxu0 %v836_v45  ;;  %v314_v16 = vld [vmem:[#allocation2 + $0x2f8] sm:$0xff]  ;;  %v311_v19 = vld [vmem:[#allocation2 + $0x2e0] sm:$0xff] }
  0x32   :  { %797 = vmatprep.subr.bf16.mxu1 %v796_v48  ;;  %v292_v48 = vld [vmem:[#allocation2 + $0x248] sm:$0xff]  ;;  %v838_v50 = vpack.c.bf16 %v289_v47, %v287_v46  ;;  %v318_v22 = vld [vmem:[#allocation2 + $0x318] sm:$0xff]  ;;  %v315_v25 = vld [vmem:[#allocation2 + $0x300] sm:$0xff] }
  0x33   :  { %v840_v51 = vpack.c.bf16 %v294_v49, %v292_v48  ;;  %v322_v28 = vld [vmem:[#allocation2 + $0x338] sm:$0xff]  ;;  %v319_v31 = vld [vmem:[#allocation2 + $0x320] sm:$0xff]  ;;  %v332_v45 = vld [vmem:[#allocation2 + $0x388] sm:$0xff] }
  0x34   :  { %839 = vmatpush1.bf16.msra.mxu0 %v838_v50  ;;  %v326_v34 = vld [vmem:[#allocation2 + $0x358] sm:$0xff]  ;;  %v870_v35 = vpack.c.bf16 %v321_v32, %v319_v31  ;;  %v323_v37 = vld [vmem:[#allocation2 + $0x340] sm:$0xff]  ;;  %v333_v50 = vld [vmem:[#allocation2 + $0x390] sm:$0xff] }
  0x35   :  { %799 = vmatpush1.bf16.msra.mxu1 %v798_v53  ;;  %v293_v53 = vld [vmem:[#allocation2 + $0x250] sm:$0xff]  ;;  %841 = vmatprep.subr.bf16.mxu0 %v840_v51  ;;  %v330_v40 = vld [vmem:[#allocation2 + $0x378] sm:$0xff]  ;;  %v874_v41 = vpack.c.bf16 %v325_v38, %v323_v37  ;;  %v327_v43 = vld [vmem:[#allocation2 + $0x360] sm:$0xff] }
  0x36   :  { %801 = vmatprep.subr.bf16.mxu1 %v800_v54  ;;  %v296_v54 = vld [vmem:[#allocation2 + $0x268] sm:$0xff]  ;;  %v842_v56 = vpack.c.bf16 %v293_v53, %v291_v52  ;;  %v876_v42 = vpack.c.bf16 %v330_v40, %v328_v39  ;;  %v334_v46 = vld [vmem:[#allocation2 + $0x398] sm:$0xff]  ;;  %v878_v47 = vpack.c.bf16 %v329_v44, %v327_v43  ;;  %v331_v49 = vld [vmem:[#allocation2 + $0x380] sm:$0xff] }
  0x37   :  { %v844_v57 = vpack.c.bf16 %v298_v55, %v296_v54  ;;  %v880_v48 = vpack.c.bf16 %v334_v46, %v332_v45  ;;  %v336_v51 = vld [vmem:[#allocation2 + $0x3a8] sm:$0xff]  ;;  %v338_v52 = vld [vmem:[#allocation2 + $0x3b8] sm:$0xff]  ;;  %v882_v53 = vpack.c.bf16 %v333_v50, %v331_v49  ;;  %v335_v55 = vld [vmem:[#allocation2 + $0x3a0] sm:$0xff] }
  0x38   :  { %843 = vmatpush1.bf16.msra.mxu0 %v842_v56  ;;  %v884_v54 = vpack.c.bf16 %v338_v52, %v336_v51  ;;  %v337_v56 = vld [vmem:[#allocation2 + $0x3b0] sm:$0xff]  ;;  %v443_v31 = vld [vmem:[#allocation2 + $0x448] sm:$0xff]  ;;  %v445_v32 = vld [vmem:[#allocation2 + $0x458] sm:$0xff] }
  0x39   :  { %803 = vmatpush1.bf16.msra.mxu1 %v802_v59  ;;  %v297_v59 = vld [vmem:[#allocation2 + $0x270] sm:$0xff]  ;;  %845 = vmatprep.subr.bf16.mxu0 %v844_v57  ;;  %v340_v57 = vld [vmem:[#allocation2 + $0x3c8] sm:$0xff]  ;;  %v449_v38 = vld [vmem:[#allocation2 + $0x478] sm:$0xff] }
  0x3a   :  { %805 = vmatprep.subr.bf16.mxu1 %v804_v60  ;;  %v300_v60 = vld [vmem:[#allocation2 + $0x288] sm:$0xff]  ;;  %v846_v62 = vpack.c.bf16 %v297_v59, %v295_v58  ;;  %v342_v58 = vld [vmem:[#allocation2 + $0x3d8] sm:$0xff]  ;;  %v886_v59 = vpack.c.bf16 %v337_v56, %v335_v55 }
  0x3b   :  { %v848_v63 = vpack.c.bf16 %v302_v61, %v300_v60  ;;  %v888_v60 = vpack.c.bf16 %v342_v58, %v340_v57  ;;  %v46_v61 = vlaneseq  ;;  %v447_v37 = vld [vmem:[#allocation2 + $0x468] sm:$0xff]  ;;  %v453_v44 = vld [vmem:[#allocation2 + $0x498] sm:$0xff] }
  0x3c   :  { %847 = vmatpush1.bf16.msra.mxu0 %v846_v62  ;;  %v908_v40 = vpack.c.bf16 %v449_v38, %v447_v37  ;;  %v451_v43 = vld [vmem:[#allocation2 + $0x488] sm:$0xff]  ;;  %v457_v50 = vld [vmem:[#allocation2 + $0x4b8] sm:$0xff] }
  0x3d   :  { %807 = vmatpush1.bf16.msra.mxu1 %v806_v1  ;;  %v301_v1 = vld [vmem:[#allocation2 + $0x290] sm:$0xff]  ;;  %849 = vmatprep.subr.bf16.mxu0 %v848_v63  ;;  %v47_v62 = vshrl.u32 %v46_v61, 7  ;;  %v912_v46 = vpack.c.bf16 %v453_v44, %v451_v43  ;;  %v455_v49 = vld [vmem:[#allocation2 + $0x4a8] sm:$0xff]  ;;  %v461_v56 = vld [vmem:[#allocation2 + $0x4d8] sm:$0xff] }
  0x3e   :  { %809 = vmatprep.subr.bf16.mxu1 %v808_v2  ;;  %v304_v2 = vld [vmem:[#allocation2 + $0x2a8] sm:$0xff]  ;;  %v850_v5 = vpack.c.bf16 %v301_v1, %v299_v0  ;;  %v44_v0 = vld [vmem:[%s1265_s2] sm:$0x3]  ;;  %v916_v52 = vpack.c.bf16 %v457_v50, %v455_v49 }
  0x3f   :  { %v852_v6 = vpack.c.bf16 %v306_v4, %v304_v2  ;;  %v1125_v63 = vsub.s32 0, %v47_v62  ;;  %v1130_v1 = vsub.s32 1, %v47_v62  ;;  %v459_v55 = vld [vmem:[#allocation2 + $0x4c8] sm:$0xff]  ;;  %v465_v62 = vld [vmem:[#allocation2 + $0x4f8] sm:$0xff] }
  0x40   :  { %851 = vmatpush1.bf16.msra.mxu0 %v850_v5  ;;  %v920_v58 = vpack.c.bf16 %v461_v56, %v459_v55  ;;  %v463_v61 = vld [vmem:[#allocation2 + $0x4e8] sm:$0xff]  ;;  %v489_v37 = vld [vmem:[#allocation2 + $0x5b8] sm:$0xff]  ;;  %v490_v55 = vld [vmem:[#allocation2 + $0x5c0] sm:$0xff] }
  0x41   :  { %811 = vmatpush1.bf16.msra.mxu1 %v810_v8  ;;  %v305_v8 = vld [vmem:[#allocation2 + $0x2b0] sm:$0xff]  ;;  %853 = vmatprep.subr.bf16.mxu0 %v852_v6  ;;  %v49_v2 = vrot.slane %v44_v0, %v1125_v63  ;;  %v53_v4 = vrot.slane %v44_v0, %v1130_v1  ;;  %v493_v43 = vld [vmem:[#allocation2 + $0x5d8] sm:$0xff] }
  0x42   :  { %813 = vmatprep.subr.bf16.mxu1 %v812_v9  ;;  %v308_v9 = vld [vmem:[#allocation2 + $0x2c8] sm:$0xff]  ;;  %v854_v11 = vpack.c.bf16 %v305_v8, %v303_v7  ;;  %v492_v56 = vld [vmem:[#allocation2 + $0x5d0] sm:$0xff] }
  0x43   :  { %v856_v12 = vpack.c.bf16 %v310_v10, %v308_v9 }
  0x44   :  { %855 = vmatpush1.bf16.msra.mxu0 %v854_v11  ;;  %v339_v11 = vld [vmem:[#allocation2 + $0x3c0] sm:$0xff] }
  0x45   :  { %815 = vmatpush1.bf16.msra.mxu1 %v814_v14  ;;  %v309_v14 = vld [vmem:[#allocation2 + $0x2d0] sm:$0xff]  ;;  %857 = vmatprep.subr.bf16.mxu0 %v856_v12 }
  0x46   :  { %817 = vmatprep.subr.bf16.mxu1 %v816_v15  ;;  %v312_v15 = vld [vmem:[#allocation2 + $0x2e8] sm:$0xff]  ;;  %v858_v17 = vpack.c.bf16 %v309_v14, %v307_v13  ;;  %v341_v12 = vld [vmem:[#allocation2 + $0x3d0] sm:$0xff] }
  0x47   :  { %v860_v18 = vpack.c.bf16 %v314_v16, %v312_v15  ;;  %v890_v13 = vpack.c.bf16 %v341_v12, %v339_v11  ;;  %v344_v14 = vld [vmem:[#allocation2 + $0x3e8] sm:$0xff]  ;;  %v346_v15 = vld [vmem:[#allocation2 + $0x3f8] sm:$0xff]  ;;  %v468_v11 = vld [vmem:[#allocation2 + $0x510] sm:$0xff] }
  0x48   :  { %859 = vmatpush1.bf16.msra.mxu0 %v858_v17  ;;  %v892_v16 = vpack.c.bf16 %v346_v15, %v344_v14  ;;  %v343_v17 = vld [vmem:[#allocation2 + $0x3e0] sm:$0xff]  ;;  %v471_v12 = vld [vmem:[#allocation2 + $0x528] sm:$0xff] }
  0x49   :  { %819 = vmatpush1.bf16.msra.mxu1 %v818_v20  ;;  %v313_v20 = vld [vmem:[#allocation2 + $0x2f0] sm:$0xff]  ;;  %861 = vmatprep.subr.bf16.mxu0 %v860_v18 }
  0x4a   :  { %821 = vmatprep.subr.bf16.mxu1 %v820_v21  ;;  %v316_v21 = vld [vmem:[#allocation2 + $0x308] sm:$0xff]  ;;  %v862_v23 = vpack.c.bf16 %v313_v20, %v311_v19  ;;  %v345_v18 = vld [vmem:[#allocation2 + $0x3f0] sm:$0xff] }
  0x4b   :  { %v864_v24 = vpack.c.bf16 %v318_v22, %v316_v21  ;;  %v894_v19 = vpack.c.bf16 %v345_v18, %v343_v17  ;;  %v435_v20 = vld [vmem:[#allocation2 + $0x408] sm:$0xff]  ;;  %v437_v21 = vld [vmem:[#allocation2 + $0x418] sm:$0xff]  ;;  %v434_v22 = vld [vmem:[#allocation2 + $0x400] sm:$0xff] }
  0x4c   :  { %863 = vmatpush1.bf16.msra.mxu0 %v862_v23  ;;  %v896_v23 = vpack.c.bf16 %v437_v21, %v435_v20  ;;  %v472_v17 = vld [vmem:[#allocation2 + $0x530] sm:$0xff]  ;;  %v475_v18 = vld [vmem:[#allocation2 + $0x548] sm:$0xff] }
  0x4d   :  { %823 = vmatpush1.bf16.msra.mxu1 %v822_v26  ;;  %v317_v26 = vld [vmem:[#allocation2 + $0x310] sm:$0xff]  ;;  %865 = vmatprep.subr.bf16.mxu0 %v864_v24 }
  0x4e   :  { %825 = vmatprep.subr.bf16.mxu1 %v824_v27  ;;  %v320_v27 = vld [vmem:[#allocation2 + $0x328] sm:$0xff]  ;;  %v866_v29 = vpack.c.bf16 %v317_v26, %v315_v25  ;;  %v436_v24 = vld [vmem:[#allocation2 + $0x410] sm:$0xff]  ;;  %v441_v26 = vld [vmem:[#allocation2 + $0x438] sm:$0xff] }
  0x4f   :  { %v439_v25 = vld [vmem:[#allocation2 + $0x428] sm:$0xff] }
  0x50   :  { %867 = vmatpush1.bf16.msra.mxu0 %v866_v29  ;;  %v438_v29 = vld [vmem:[#allocation2 + $0x420] sm:$0xff] }
  0x51   :  { %827 = vmatpush1.bf16.msra.mxu1 %v826_v30  ;;  %v868_v30 = vpack.c.bf16 %v322_v28, %v320_v27  ;;  %v898_v27 = vpack.c.bf16 %v436_v24, %v434_v22  ;;  %v900_v28 = vpack.c.bf16 %v441_v26, %v439_v25  ;;  %v474_v22 = vld [vmem:[#allocation2 + $0x540] sm:$0xff]  ;;  %v479_v24 = vld [vmem:[#allocation2 + $0x568] sm:$0xff]  ;;  %v481_v25 = vld [vmem:[#allocation2 + $0x578] sm:$0xff] }
  0x52   :  { %829 = vmatprep.subr.bf16.mxu1 %v828_v33  ;;  %v324_v33 = vld [vmem:[#allocation2 + $0x348] sm:$0xff] }
  0x53   :  { %869 = vmatprep.subr.bf16.mxu0 %v868_v30  ;;  %v440_v30 = vld [vmem:[#allocation2 + $0x430] sm:$0xff] }
  0x54   :  { %871 = vmatpush1.bf16.msra.mxu0 %v870_v35  ;;  %v442_v35 = vld [vmem:[#allocation2 + $0x440] sm:$0xff] }
  0x55   :  { %831 = vmatpush1.bf16.msra.mxu1 %v830_v36  ;;  %v872_v36 = vpack.c.bf16 %v326_v34, %v324_v33  ;;  %v902_v33 = vpack.c.bf16 %v440_v30, %v438_v29  ;;  %v904_v34 = vpack.c.bf16 %v445_v32, %v443_v31  ;;  %v480_v29 = vld [vmem:[#allocation2 + $0x570] sm:$0xff]  ;;  %v483_v30 = vld [vmem:[#allocation2 + $0x588] sm:$0xff]  ;;  %v485_v31 = vld [vmem:[#allocation2 + $0x598] sm:$0xff] }
  0x56   :  { %897 = vmatprep.subr.bf16.mxu1 %v896_v23  ;;  %v476_v23 = vld [vmem:[#allocation2 + $0x550] sm:$0xff] }
  0x57   :  { %873 = vmatprep.subr.bf16.mxu0 %v872_v36  ;;  %v444_v36 = vld [vmem:[#allocation2 + $0x450] sm:$0xff]  ;;  %v938_v26 = vpack.c.bf16 %v476_v23, %v474_v22 }
  0x58   :  { %875 = vmatpush1.bf16.msra.mxu0 %v874_v41  ;;  %v906_v39 = vpack.c.bf16 %v444_v36, %v442_v35  ;;  %v446_v41 = vld [vmem:[#allocation2 + $0x460] sm:$0xff]  ;;  %v484_v35 = vld [vmem:[#allocation2 + $0x590] sm:$0xff]  ;;  %v487_v36 = vld [vmem:[#allocation2 + $0x5a8] sm:$0xff] }
  0x59   :  { %877 = vmatprep.subr.bf16.mxu0 %v876_v42  ;;  %v448_v42 = vld [vmem:[#allocation2 + $0x470] sm:$0xff] }
  0x5a   :  { %v910_v45 = vpack.c.bf16 %v448_v42, %v446_v41  ;;  %v488_v41 = vld [vmem:[#allocation2 + $0x5b0] sm:$0xff]  ;;  %v491_v42 = vld [vmem:[#allocation2 + $0x5c8] sm:$0xff] }
  0x5c   :  { %879 = vmatpush1.bf16.msra.mxu0 %v878_v47  ;;  %v450_v47 = vld [vmem:[#allocation2 + $0x480] sm:$0xff] }
  0x5d   :  { %881 = vmatprep.subr.bf16.mxu0 %v880_v48  ;;  %v452_v48 = vld [vmem:[#allocation2 + $0x490] sm:$0xff] }
  0x5e   :  { %v914_v51 = vpack.c.bf16 %v452_v48, %v450_v47 }
  0x60   :  { %883 = vmatpush1.bf16.msra.mxu0 %v882_v53  ;;  %v454_v53 = vld [vmem:[#allocation2 + $0x4a0] sm:$0xff] }
  0x61   :  { %885 = vmatprep.subr.bf16.mxu0 %v884_v54  ;;  %v456_v54 = vld [vmem:[#allocation2 + $0x4b0] sm:$0xff] }
  0x62   :  { %v918_v57 = vpack.c.bf16 %v456_v54, %v454_v53 }
  0x64   :  { %887 = vmatpush1.bf16.msra.mxu0 %v886_v59  ;;  %v458_v59 = vld [vmem:[#allocation2 + $0x4c0] sm:$0xff] }
  0x65   :  { %889 = vmatprep.subr.bf16.mxu0 %v888_v60  ;;  %v460_v60 = vld [vmem:[#allocation2 + $0x4d0] sm:$0xff] }
  0x66   :  { %v922_v0 = vpack.c.bf16 %v460_v60, %v458_v59  ;;  %v497_v59 = vld [vmem:[#allocation2 + $0x5f8] sm:$0xff] }
  0x68   :  { %891 = vmatpush1.bf16.msra.mxu0 %v890_v13  ;;  %v473_v13 = vld [vmem:[#allocation2 + $0x538] sm:$0xff] }
  0x69   :  { %893 = vmatprep.subr.bf16.mxu0 %v892_v16  ;;  %v932_v15 = vpack.c.bf16 %v473_v13, %v471_v12  ;;  %v470_v16 = vld [vmem:[#allocation2 + $0x520] sm:$0xff]  ;;  %v586_v12 = vld [vmem:[%s1268_s5 + $0x10] sm:$0xff]  ;;  %v587_v13 = vld [vmem:[%s1268_s5 + $0x18] sm:$0xff] }
  0x6a   :  { %v934_v20 = vpack.c.bf16 %v472_v17, %v470_v16  ;;  %v966_v16 = vpack.c.bf16 %v587_v13, %v586_v12 }
  0x6c   :  { %895 = vmatpush1.bf16.msra.mxu0 %v894_v19  ;;  %v477_v19 = vld [vmem:[#allocation2 + $0x558] sm:$0xff] }
  0x6d   :  { %v936_v21 = vpack.c.bf16 %v477_v19, %v475_v18  ;;  %v588_v18 = vld [vmem:[%s1268_s5 + $0x20] sm:$0xff]  ;;  %v589_v19 = vld [vmem:[%s1268_s5 + $0x28] sm:$0xff] }
  0x6e   :  { %v970_v22 = vpack.c.bf16 %v589_v19, %v588_v18 }
  0xe9   :  { %v126_v5 = vpop.f32.mrb[0].mxu0 }
  0xea   :  { %v127_v6 = vadd.f32 %v126_v5, %v49_v2  ;;  %v128_v7 = vpop.f32.mrb[1].mxu0  ;;  %v924_v2 = vpack.c.bf16 %v465_v62, %v463_v61  ;;  %v464_v5 = vld [vmem:[#allocation2 + $0x4f0] sm:$0xff]  ;;  %v494_v61 = vld [vmem:[#allocation2 + $0x5e0] sm:$0xff] }
  0xeb   :  { %v129_v8 = vadd.f32 %v128_v7, %v53_v4  ;;  %v462_v4 = vld [vmem:[#allocation2 + $0x4e0] sm:$0xff]  ;;  %v469_v7 = vld [vmem:[#allocation2 + $0x518] sm:$0xff]  ;;  %v496_v62 = vld [vmem:[#allocation2 + $0x5f0] sm:$0xff] }
  0xec   :  { %v131_v10 = vmax.f32 %v127_v6, 0.0  ;;  %v467_v6 = vld [vmem:[#allocation2 + $0x508] sm:$0xff] }
  0xed   :  { %v132_v9 = vmax.f32 %v129_v8, 0.0  ;;  %v926_v8 = vpack.c.bf16 %v464_v5, %v462_v4  ;;  %v601_v4 = vld [vmem:[%s1268_s5 + $0x88] sm:$0xff]  ;;  %v584_v5 = vld [vmem:[%s1268_s5] sm:$0xff] }
  0xef   :  { %273 = vmatprep.mubr.f32.mxu1 %v132_v9  ;;  %v928_v9 = vpack.c.bf16 %v469_v7, %v467_v6  ;;  %v585_v7 = vld [vmem:[%s1268_s5 + $0x8] sm:$0xff] }
  0xf0   :  { %274 = vmatmul.mubr.f32.vlgmr.msra.gmra.mrb[0].mxu1 %v131_v10  ;;  %v466_v10 = vld [vmem:[#allocation2 + $0x500] sm:$0xff] }
  0xf1   :  { %899 = vmatpush1.bf16.msra.mxu1 %v898_v27  ;;  %v930_v14 = vpack.c.bf16 %v468_v11, %v466_v10  ;;  %v940_v27 = vpack.c.bf16 %v481_v25, %v479_v24  ;;  %v962_v10 = vpack.c.bf16 %v585_v7, %v584_v5  ;;  %v590_v24 = vld [vmem:[%s1268_s5 + $0x30] sm:$0xff]  ;;  %v591_v25 = vld [vmem:[%s1268_s5 + $0x38] sm:$0xff] }
  0xf2   :  { %901 = vmatprep.subr.bf16.mxu1 %v900_v28  ;;  %v478_v28 = vld [vmem:[#allocation2 + $0x560] sm:$0xff] }
  0xf3   :  { %v942_v32 = vpack.c.bf16 %v480_v29, %v478_v28  ;;  %v974_v28 = vpack.c.bf16 %v591_v25, %v590_v24 }
  0xf5   :  { %903 = vmatpush1.bf16.msra.mxu1 %v902_v33  ;;  %v944_v33 = vpack.c.bf16 %v485_v31, %v483_v30  ;;  %v592_v30 = vld [vmem:[%s1268_s5 + $0x40] sm:$0xff]  ;;  %v593_v31 = vld [vmem:[%s1268_s5 + $0x48] sm:$0xff] }
  0xf6   :  { %905 = vmatprep.subr.bf16.mxu1 %v904_v34  ;;  %v482_v34 = vld [vmem:[#allocation2 + $0x580] sm:$0xff] }
  0xf7   :  { %v946_v38 = vpack.c.bf16 %v484_v35, %v482_v34  ;;  %v978_v34 = vpack.c.bf16 %v593_v31, %v592_v30 }
  0xf9   :  { %907 = vmatpush1.bf16.msra.mxu1 %v906_v39  ;;  %v948_v39 = vpack.c.bf16 %v489_v37, %v487_v36  ;;  %v594_v36 = vld [vmem:[%s1268_s5 + $0x50] sm:$0xff]  ;;  %v595_v37 = vld [vmem:[%s1268_s5 + $0x58] sm:$0xff] }
  0xfa   :  { %909 = vmatprep.subr.bf16.mxu1 %v908_v40  ;;  %v486_v40 = vld [vmem:[#allocation2 + $0x5a0] sm:$0xff] }
  0xfb   :  { %v950_v44 = vpack.c.bf16 %v488_v41, %v486_v40  ;;  %v982_v40 = vpack.c.bf16 %v595_v37, %v594_v36 }
  0xfd   :  { %911 = vmatpush1.bf16.msra.mxu1 %v910_v45  ;;  %v952_v45 = vpack.c.bf16 %v493_v43, %v491_v42  ;;  %v730_v42 = vld [vmem:[%s1267_s4 + $0x2] sm:$0x3] }
  0xfe   :  { %913 = vmatprep.subr.bf16.mxu1 %v912_v46  ;;  %v197_v46 = vld [vmem:[%s1267_s4] sm:$0x3]  ;;  %v353_v43 = vrot.slane %v730_v42, %v1125_v63 }
  0xff   :  { %v202_v47 = vrot.slane %v197_v46, %v1125_v63  ;;  %v206_v48 = vrot.slane %v197_v46, %v1130_v1 }
 0x101   :  { %915 = vmatpush1.bf16.msra.mxu1 %v914_v51 }
 0x102   :  { %917 = vmatprep.subr.bf16.mxu1 %v916_v52 }
 0x105   :  { %919 = vmatpush1.bf16.msra.mxu1 %v918_v57  ;;  %v954_v57 = vpack.c.bf16 %v492_v56, %v490_v55  ;;  %v615_v55 = vld [vmem:[%s1268_s5 + $0xf8] sm:$0xff] }
 0x106   :  { %921 = vmatprep.subr.bf16.mxu1 %v920_v58  ;;  %v495_v58 = vld [vmem:[#allocation2 + $0x5e8] sm:$0xff] }
 0x107   :  { %v956_v60 = vpack.c.bf16 %v497_v59, %v495_v58  ;;  %v599_v58 = vld [vmem:[%s1268_s5 + $0x78] sm:$0xff] }
 0x109   :  { %923 = vmatpush1.bf16.msra.mxu1 %v922_v0  ;;  %v958_v0 = vpack.c.bf16 %v496_v62, %v494_v61  ;;  %v1056_v61 = vmov 4   ;;  %v731_v62 = vld [vmem:[%s1267_s4 + $0x4] sm:$0x3]  ;;  %s1057_s4 = smov 120  }
 0x10a   :  { %925 = vmatprep.subr.bf16.mxu1 %v924_v2  ;;  %v600_v2 = vld [vmem:[%s1268_s5 + $0x80] sm:$0xff] }
 0x10b   :  { %v960_v6 = vpack.c.bf16 %v601_v4, %v600_v2  ;;  %v508_v2 = vrot.slane %v731_v62, %v1130_v1 }
 0x10d   :  { %927 = vmatpush1.bf16.msra.mxu1 %v926_v8  ;;  %v602_v8 = vld [vmem:[%s1268_s5 + $0x90] sm:$0xff]  ;;  %961 = vmatprep.subr.bf16.mxu0 %v960_v6 }
 0x10e   :  { %929 = vmatprep.subr.bf16.mxu1 %v928_v9  ;;  %v603_v9 = vld [vmem:[%s1268_s5 + $0x98] sm:$0xff] }
 0x10f   :  { %v964_v11 = vpack.c.bf16 %v603_v9, %v602_v8 }
 0x111   :  { %931 = vmatpush1.bf16.msra.mxu1 %v930_v14  ;;  %v604_v14 = vld [vmem:[%s1268_s5 + $0xa0] sm:$0xff] }
 0x112   :  { %933 = vmatprep.subr.bf16.mxu1 %v932_v15  ;;  %v605_v15 = vld [vmem:[%s1268_s5 + $0xa8] sm:$0xff] }
 0x113   :  { %v968_v17 = vpack.c.bf16 %v605_v15, %v604_v14 }
 0x115   :  { %935 = vmatpush1.bf16.msra.mxu1 %v934_v20  ;;  %v606_v20 = vld [vmem:[%s1268_s5 + $0xb0] sm:$0xff] }
 0x116   :  { %937 = vmatprep.subr.bf16.mxu1 %v936_v21  ;;  %v607_v21 = vld [vmem:[%s1268_s5 + $0xb8] sm:$0xff] }
 0x117   :  { %v972_v23 = vpack.c.bf16 %v607_v21, %v606_v20 }
 0x119   :  { %939 = vmatpush1.bf16.msra.mxu1 %v938_v26  ;;  %v608_v26 = vld [vmem:[%s1268_s5 + $0xc0] sm:$0xff] }
 0x11a   :  { %941 = vmatprep.subr.bf16.mxu1 %v940_v27  ;;  %v609_v27 = vld [vmem:[%s1268_s5 + $0xc8] sm:$0xff] }
 0x11b   :  { %v976_v29 = vpack.c.bf16 %v609_v27, %v608_v26 }
 0x11d   :  { %943 = vmatpush1.bf16.msra.mxu1 %v942_v32  ;;  %v610_v32 = vld [vmem:[%s1268_s5 + $0xd0] sm:$0xff] }
 0x11e   :  { %945 = vmatprep.subr.bf16.mxu1 %v944_v33  ;;  %v611_v33 = vld [vmem:[%s1268_s5 + $0xd8] sm:$0xff] }
 0x11f   :  { %v980_v35 = vpack.c.bf16 %v611_v33, %v610_v32 }
 0x121   :  { %947 = vmatpush1.bf16.msra.mxu1 %v946_v38  ;;  %v612_v38 = vld [vmem:[%s1268_s5 + $0xe0] sm:$0xff] }
 0x122   :  { %949 = vmatprep.subr.bf16.mxu1 %v948_v39  ;;  %v613_v39 = vld [vmem:[%s1268_s5 + $0xe8] sm:$0xff] }
 0x123   :  { %v984_v41 = vpack.c.bf16 %v613_v39, %v612_v38 }
 0x125   :  { %951 = vmatpush1.bf16.msra.mxu1 %v950_v44  ;;  %v357_v44 = vrot.slane %v730_v42, %v1130_v1 }
 0x126   :  { %953 = vmatprep.subr.bf16.mxu1 %v952_v45 }
 0x129   :  { %955 = vmatpush1.bf16.msra.mxu1 %v954_v57  ;;  %v598_v57 = vld [vmem:[%s1268_s5 + $0x70] sm:$0xff] }
 0x12a   :  { %957 = vmatprep.subr.bf16.mxu1 %v956_v60  ;;  %v990_v59 = vpack.c.bf16 %v599_v58, %v598_v57  ;;  %v1055_v60 = vmov 3  }
 0x12b   :  { %1001 = vset.pattern.permute.xlu0 %v1055_v60 }
 0x12c   :  { %694 = vperm.xlu0 %1001, %v1121_v3  }
 0x12d   :  { %959 = vmatpush1.bf16.msra.mxu1 %v958_v0  ;;  %v504_v0 = vrot.slane %v731_v62, %v1125_v63 }
 0x130   :  { %1002 = vset.pattern.permute.xlu0 %v1056_v61 }
 0x131   :  { %704 = vperm.xlu0 %1002, %v1121_v3   ;;  %v732_v3 = vld [vmem:[%s1269_s6] ss:$0 sm:$0xff]  ;;  %s1025_s6 = scalar_lea.vmem %s721_s15, 128 }
 0x132   :  { %p1026_p8 = scmp.ne.s32.totalorder %s721_s15, %s1025_s6  ;;  %p1031_p10 = scmp.lt.s32.totalorder %s1025_s6, %s1025_s6 }
 0x134   :  { %p1032_p11 = por %p1031_p10, %p1030_p9 }
 0x136   :  { %p1033_p12 = pnand %p1032_p11, %p1026_p8 }
 0x1c3   :  { %v275_v49 = vpop.f32.mrb[0].mxu1 }
 0x1c4   :  { %v276_v50 = vadd.f32 %v275_v49, %v202_v47  ;;  %v277_v51 = vpop.f32.mrb[1].mxu1 }
 0x1c5   :  { %v278_v52 = vadd.f32 %v277_v51, %v206_v48  ;;  %v596_v51 = vld [vmem:[%s1268_s5 + $0x60] sm:$0xff] }
 0x1c6   :  { %v280_v54 = vmax.f32 %v276_v50, 0.0 }
 0x1c7   :  { %v281_v53 = vmax.f32 %v278_v52, 0.0  ;;  %v597_v52 = vld [vmem:[%s1268_s5 + $0x68] sm:$0xff] }
 0x1c9   :  { %424 = vmatprep.mubr.f32.mxu0 %v281_v53  ;;  %v986_v53 = vpack.c.bf16 %v597_v52, %v596_v51 }
 0x1ca   :  { %425 = vmatmul.mubr.f32.vlgmr.msra.gmra.mrb[2].mxu0 %v280_v54  ;;  %v614_v54 = vld [vmem:[%s1268_s5 + $0xf0] sm:$0xff] }
 0x1cb   :  { %963 = vmatpush3.bf16.msra.mxu0 %v962_v10  ;;  %v988_v56 = vpack.c.bf16 %v615_v55, %v614_v54 }
 0x1cc   :  { %965 = vmatprep.subr.bf16.mxu0 %v964_v11  ;;  %v695_v11 = vpop.permute.xlu0 %694 }
 0x1cf   :  { %967 = vmatpush3.bf16.msra.mxu0 %v966_v16 }
 0x1d0   :  { %969 = vmatprep.subr.bf16.mxu0 %v968_v17  ;;  %v705_v15 = vpop.permute.xlu0 %704 }
 0x1d3   :  { %971 = vmatpush3.bf16.msra.mxu0 %v970_v22 }
 0x1d4   :  { %973 = vmatprep.subr.bf16.mxu0 %v972_v23 }
 0x1d7   :  { %975 = vmatpush3.bf16.msra.mxu0 %v974_v28 }
 0x1d8   :  { %977 = vmatprep.subr.bf16.mxu0 %v976_v29 }
 0x1db   :  { %979 = vmatpush3.bf16.msra.mxu0 %v978_v34 }
 0x1dc   :  { %981 = vmatprep.subr.bf16.mxu0 %v980_v35 }
 0x1df   :  { %983 = vmatpush3.bf16.msra.mxu0 %v982_v40 }
 0x1e0   :  { %985 = vmatprep.subr.bf16.mxu0 %v984_v41 }
 0x1e3   :  { %987 = vmatpush3.bf16.msra.mxu0 %v986_v53 }
 0x1e4   :  { %989 = vmatprep.subr.bf16.mxu0 %v988_v56 }
 0x1e7   :  { %991 = vmatpush3.bf16.msra.mxu0 %v990_v59 }
 0x29d   :  { %v426_v45 = vpop.f32.mrb[2].mxu0 }
 0x29e   :  { %v427_v46 = vadd.f32 %v426_v45, %v353_v43  ;;  %v428_v47 = vpop.f32.mrb[3].mxu0 }
 0x29f   :  { %v429_v48 = vadd.f32 %v428_v47, %v357_v44 }
 0x2a0   :  { %v431_v50 = vmax.f32 %v427_v46, 0.0 }
 0x2a1   :  { %v432_v49 = vmax.f32 %v429_v48, 0.0 }
 0x2a3   :  { %575 = vmatprep.mubr.f32.mxu1 %v432_v49 }
 0x2a4   :  { %576 = vmatmul.mubr.f32.vlgmr.msra.gmra.mrb[2].mxu1 %v431_v50 }
 0x377   :  { %v577_v4 = vpop.f32.mrb[2].mxu1 }
 0x378   :  { %v578_v5 = vadd.f32 %v577_v4, %v504_v0  ;;  %v579_v6 = vpop.f32.mrb[3].mxu1 }
 0x379   :  { %v580_v7 = vadd.f32 %v579_v6, %v508_v2 }
 0x37a   :  { %v582_v9 = vmax.f32 %v578_v5, 0.0 }
 0x37b   :  { %v583_v8 = vmax.f32 %v580_v7, 0.0 }
 0x37d   :  { %687 = vmatprep.mubr.f32.mxu0 %v583_v8 }
 0x37e   :  { %688 = vmatmul.mubr.f32.vlgmr.msra.gmra.mrb[4].mxu0 %v582_v9 }
 0x451   :  { %v765_v10 = vpop.f32.mrb[4].mxu0 }
 0x452   :  { %v766_v12 = vpop.f32.mrb[5].mxu0 }
 0x453   :  { %v767_v13 = vadd.f32 %v766_v12, %v765_v10 }
 0x455   :  { %v690_v14 = vadd.f32 %v767_v13, %v732_v3 }
 0x457   :  { %v697_v63 = vmul.f32 %v695_v11, %v690_v14  ;;  %v707_v1 = vmul.f32 %v705_v15, %v690_v14 }
 0x459   :  { %699 = vrot.lane.b32.xlu1 %v697_v63, %s1057_s4 }
 0x45d   :  { %709 = vrot.lane.b32.xlu1 %v707_v1, %s1058_s13 }
 0x4cb   :  { %v700_v16 = vpop.permute.xlu1 %699 }
 0x4cc   :  { %v702_v17 = vadd.f32 %v700_v16, %v690_v14 }
 0x4cf   :  { %v710_v18 = vpop.permute.xlu1 %709 }
 0x4d0   :  { %v712_v19 = vadd.f32 %v710_v18, %v702_v17 }
 0x4d2   :  { %713 = vst.msk [vmem:[#allocation5] sm:$0xff] %vm56_vm0, %v712_v19 }
 0x4d3   :  { %1036 = shalt.err (!%p1033_p12)
}
 0x4d4   :  { %s1037_s18 = scalar_lea.hbm %s1270_s7, 128 }
 0x4d5   :  { %p1038_p13 = scmp.ne.s32.totalorder %s1270_s7, %s1037_s18  ;;  %p1041_p0 = scmp.lt.u32.totalorder %s1037_s18, %s1270_s7 }
 0x4d7   :  { %p1043_p1 = pnand %p1041_p0, %p1038_p13 }
 0x4d9   :  { %1046 = shalt.err (!%p1043_p1)
}
 0x4da   :  { %723 = dma.vmem_to_hbm [thread:$0]  %s721_s15, 128, %s1270_s7, [#allocation4]  }
 0x4db   :  { %1049 = dma.done.wait [#allocation4], 128  }
 0x4dc   :  { %1050 = vsyncadd [#allocation4], 4294967168 }
 0x4dd   :  { %727 = vsyncpa [#allocation3], 1 }
 0x4de   :  { %728 = vsyncpa [#allocation4], 1 }

</bundles_post_ra>
